<compile_context>
chip_gen: v7x
topology: tpu7x:2x2x1
jax: 0.10.0
libtpu: 0.0.40
codegen_flags: <defaults>
</compile_context>

<pallas_src>
import functools

import jax
import jax.numpy as jnp
from jax.experimental import pallas as pl
from jax.experimental.pallas import tpu as pltpu

SCALE_BOUND = 0.11          # GaussianConditional default scale_bound
LIKELIHOOD_BOUND = 1e-9     # EntropyModel default likelihood_bound
_INV_SQRT2 = 2.0 ** (-0.5)

_LANE_W = 512               # lane-dense last dim (multiple of 128)
_TILE_R = 512               # rows per grid step -> 512x512 f32 = 1 MiB / stream


def _erf(x):
    # Abramowitz & Stegun 7.1.26, max abs error ~1.5e-7.  Uses only exp and
    # VPU arithmetic so it lowers on Mosaic and runs in interpret mode.
    a1, a2, a3, a4, a5 = (0.254829592, -0.284496736, 1.421413741,
                          -1.453152027, 1.061405429)
    p = 0.3275911
    ax = jnp.abs(x)
    t = 1.0 / (1.0 + p * ax)
    poly = t * (a1 + t * (a2 + t * (a3 + t * (a4 + t * a5))))
    y = 1.0 - poly * jnp.exp(-ax * ax)
    return jnp.where(x < 0.0, -y, y)


def _std_cumulative(x):
    # _standardized_cumulative: 0.5 * erfc(-(2**-0.5) * x) == 0.5*(1 + erf(x/sqrt(2)))
    return 0.5 * (1.0 + _erf(_INV_SQRT2 * x))


def _gc_kernel(*refs, training, has_means):
    it = iter(refs)
    x_ref = next(it)
    s_ref = next(it)
    m_ref = next(it) if has_means else None
    n_ref = next(it) if training else None
    out_ref = next(it)
    lik_ref = next(it)

    x = x_ref[...].astype(jnp.float32)
    s = s_ref[...].astype(jnp.float32)
    m = m_ref[...].astype(jnp.float32) if has_means else None

    if training:
        # quantize(..., 'noise'): additive uniform noise in [-0.5, 0.5)
        outputs = x + n_ref[...].astype(jnp.float32)
    elif has_means:
        # quantize(..., 'dequantize', means): round(x - means) + means
        outputs = jnp.round(x - m) + m
    else:
        outputs = jnp.round(x)

    # _likelihood
    values = jnp.abs(outputs - m) if has_means else jnp.abs(outputs)
    sc = jnp.maximum(s, jnp.float32(SCALE_BOUND))        # LowerBound(scale_bound)
    inv = 1.0 / sc                                       # one divide, reused twice
    upper = _std_cumulative((0.5 - values) * inv)
    lower = _std_cumulative((-0.5 - values) * inv)
    lik = jnp.maximum(upper - lower, jnp.float32(LIKELIHOOD_BOUND))

    out_ref[...] = outputs.astype(out_ref.dtype)
    lik_ref[...] = lik.astype(lik_ref.dtype)


@functools.partial(jax.jit, static_argnames=("training",))
def gaussian_conditional_forward(inputs, scales, means=None, training=False, key=None):
    """Returns (outputs, likelihood), both with the shape/dtype of `inputs`."""
    orig_shape = inputs.shape
    out_dtype = inputs.dtype
    total = inputs.size
    has_means = means is not None

    pad = (-total) % _LANE_W          # pad only if numel isn't lane-divisible
    rows = (total + pad) // _LANE_W

    def to_slab(a):
        flat = a.reshape(-1)
        if pad:
            flat = jnp.pad(flat, (0, pad))
        return flat.reshape(rows, _LANE_W)

    operands = [to_slab(inputs), to_slab(scales)]
    if has_means:
        operands.append(to_slab(means))
    if training:
        if key is None:
            key = jax.random.PRNGKey(0)
        # CompressAI draws U(-0.5, 0.5) from the framework RNG; do the same
        # (instead of the TPU hardware PRNG, which has no interpret lowering).
        noise = jax.random.uniform(key, (rows, _LANE_W), jnp.float32,
                                   minval=-0.5, maxval=0.5)
        operands.append(noise)

    tile_r = min(_TILE_R, rows)
    grid = (pl.cdiv(rows, tile_r),)   # last block may overhang; writes masked
    bspec = pl.BlockSpec((tile_r, _LANE_W), lambda i: (i, 0))

    kernel = functools.partial(_gc_kernel, training=training, has_means=has_means)
    out2, lik2 = pl.pallas_call(
        kernel,
        out_shape=(
            jax.ShapeDtypeStruct((rows, _LANE_W), out_dtype),
            jax.ShapeDtypeStruct((rows, _LANE_W), out_dtype),
        ),
        grid=grid,
        in_specs=[bspec] * len(operands),
        out_specs=(bspec, bspec),
        compiler_params=pltpu.CompilerParams(
            dimension_semantics=("parallel",)),
    )(*operands)

    def from_slab(a):
        flat = a.reshape(-1)
        if pad:
            flat = flat[:total]
        return flat.reshape(orig_shape)

    return from_slab(out2), from_slab(lik2)


def _reference_eval(inputs, scales, means):
    # Pure-JAX reference for the deterministic (eval / dequantize) path.
    outputs = jnp.round(inputs - means) + means
    values = jnp.abs(outputs - means)
    sc = jnp.maximum(scales, SCALE_BOUND)
    upper = 0.5 * jax.scipy.special.erfc(-_INV_SQRT2 * (0.5 - values) / sc)
    lower = 0.5 * jax.scipy.special.erfc(-_INV_SQRT2 * (-0.5 - values) / sc)
    lik = jnp.maximum(upper - lower, LIKELIHOOD_BOUND)
    return outputs, lik


if __name__ == "__main__":
    key = jax.random.PRNGKey(0)
    k1, k2, k3, k4 = jax.random.split(key, 4)

    # NCHW, same convention as the PyTorch module.
    x = 3.0 * jax.random.normal(k1, (2, 4, 16, 16), dtype=jnp.float32)
    scales = jax.random.uniform(k2, (2, 4, 16, 16), dtype=jnp.float32,
                                minval=0.01, maxval=2.0)
    means = 0.5 * jax.random.normal(k3, (2, 4, 16, 16), dtype=jnp.float32)

    # Eval / dequantize path (deterministic) — check against pure-JAX reference.
    out, lik = gaussian_conditional_forward(x, scales, means, training=False)
    out, lik = jax.block_until_ready((out, lik))
    ref_out, ref_lik = _reference_eval(x, scales, means)
    assert out.shape == x.shape and lik.shape == x.shape
    assert jnp.allclose(out, ref_out, atol=1e-5, rtol=1e-5)
    assert jnp.allclose(lik, ref_lik, atol=1e-5, rtol=1e-5)

    # means=None specialization (no means stream).
    out0, lik0 = gaussian_conditional_forward(x, scales, training=False)
    out0, lik0 = jax.block_until_ready((out0, lik0))
    ref_out0, ref_lik0 = _reference_eval(x, scales, jnp.zeros_like(x))
    assert jnp.allclose(out0, ref_out0, atol=1e-5, rtol=1e-5)
    assert jnp.allclose(lik0, ref_lik0, atol=1e-5, rtol=1e-5)

    # Training path: additive U(-0.5, 0.5) noise streamed into the kernel.
    out_t, lik_t = gaussian_conditional_forward(x, scales, means,
                                                training=True, key=k4)
    out_t, lik_t = jax.block_until_ready((out_t, lik_t))
    noise = out_t - x
    assert jnp.all(noise >= -0.5 - 1e-5) and jnp.all(noise <= 0.5 + 1e-5)
    assert jnp.all(lik_t >= LIKELIHOOD_BOUND)

    print("KERNEL_OK")
</pallas_src>

<mosaic_0001>
module attributes {stable_mosaic.version = 11 : i64} {
  func.func @_gc_kernel(%arg0: i32, %arg1: memref<4x512xf32, #tpu.memory_space<vmem>>, %arg2: memref<4x512xf32, #tpu.memory_space<vmem>>, %arg3: memref<4x512xf32, #tpu.memory_space<vmem>>, %arg4: memref<4x512xf32, #tpu.memory_space<vmem>>, %arg5: memref<4x512xf32, #tpu.memory_space<vmem>>) attributes {dimension_semantics = [#tpu.dimension_semantics<parallel>], iteration_bounds = array<i64: 1>, scalar_prefetch = 0 : i64, scratch_operands = 0 : i64, tpu.core_type = #tpu.core_type<tc>, window_params = [{transform_indices = @transform_0, window_bounds = array<i64: 4, 512>}, {transform_indices = @transform_1, window_bounds = array<i64: 4, 512>}, {transform_indices = @transform_2, window_bounds = array<i64: 4, 512>}, {transform_indices = @transform_3, window_bounds = array<i64: 4, 512>}, {transform_indices = @transform_4, window_bounds = array<i64: 4, 512>}]} {
    %c0 = arith.constant 0 : index
    %c0_0 = arith.constant 0 : index
    %0 = vector.load %arg1[%c0, %c0_0] : memref<4x512xf32, #tpu.memory_space<vmem>>, vector<4x512xf32>
    %c0_1 = arith.constant 0 : index
    %c0_2 = arith.constant 0 : index
    %1 = vector.load %arg2[%c0_1, %c0_2] : memref<4x512xf32, #tpu.memory_space<vmem>>, vector<4x512xf32>
    %c0_3 = arith.constant 0 : index
    %c0_4 = arith.constant 0 : index
    %2 = vector.load %arg3[%c0_3, %c0_4] : memref<4x512xf32, #tpu.memory_space<vmem>>, vector<4x512xf32>
    %3 = arith.subf %0, %2 : vector<4x512xf32>
    %4 = math.roundeven %3 : vector<4x512xf32>
    %5 = arith.addf %4, %2 : vector<4x512xf32>
    %6 = arith.subf %5, %2 : vector<4x512xf32>
    %7 = math.absf %6 : vector<4x512xf32>
    %cst = arith.constant 1.100000e-01 : f32
    %8 = vector.broadcast %cst : f32 to vector<4x512xf32>
    %9 = arith.maximumf %1, %8 : vector<4x512xf32>
    %cst_5 = arith.constant 1.000000e+00 : f32
    %10 = vector.broadcast %cst_5 : f32 to vector<4x512xf32>
    %11 = arith.divf %10, %9 : vector<4x512xf32>
    %cst_6 = arith.constant 5.000000e-01 : f32
    %12 = vector.broadcast %cst_6 : f32 to vector<4x512xf32>
    %13 = arith.subf %12, %7 : vector<4x512xf32>
    %14 = arith.mulf %13, %11 : vector<4x512xf32>
    %cst_7 = arith.constant 0.707106769 : f32
    %15 = vector.broadcast %cst_7 : f32 to vector<4x512xf32>
    %16 = arith.mulf %15, %14 : vector<4x512xf32>
    %17 = math.absf %16 : vector<4x512xf32>
    %cst_8 = arith.constant 0.327591091 : f32
    %18 = vector.broadcast %cst_8 : f32 to vector<4x512xf32>
    %19 = arith.mulf %18, %17 : vector<4x512xf32>
    %cst_9 = arith.constant 1.000000e+00 : f32
    %20 = vector.broadcast %cst_9 : f32 to vector<4x512xf32>
    %21 = arith.addf %20, %19 : vector<4x512xf32>
    %cst_10 = arith.constant 1.000000e+00 : f32
    %22 = vector.broadcast %cst_10 : f32 to vector<4x512xf32>
    %23 = arith.divf %22, %21 : vector<4x512xf32>
    %cst_11 = arith.constant 1.06140542 : f32
    %24 = vector.broadcast %cst_11 : f32 to vector<4x512xf32>
    %25 = arith.mulf %23, %24 : vector<4x512xf32>
    %cst_12 = arith.constant -1.45315206 : f32
    %26 = vector.broadcast %cst_12 : f32 to vector<4x512xf32>
    %27 = arith.addf %26, %25 : vector<4x512xf32>
    %28 = arith.mulf %23, %27 : vector<4x512xf32>
    %cst_13 = arith.constant 1.42141378 : f32
    %29 = vector.broadcast %cst_13 : f32 to vector<4x512xf32>
    %30 = arith.addf %29, %28 : vector<4x512xf32>
    %31 = arith.mulf %23, %30 : vector<4x512xf32>
    %cst_14 = arith.constant -0.284496725 : f32
    %32 = vector.broadcast %cst_14 : f32 to vector<4x512xf32>
    %33 = arith.addf %32, %31 : vector<4x512xf32>
    %34 = arith.mulf %23, %33 : vector<4x512xf32>
    %cst_15 = arith.constant 0.254829586 : f32
    %35 = vector.broadcast %cst_15 : f32 to vector<4x512xf32>
    %36 = arith.addf %35, %34 : vector<4x512xf32>
    %37 = arith.mulf %23, %36 : vector<4x512xf32>
    %cst_16 = arith.constant 0.000000e+00 : f32
    %38 = vector.broadcast %cst_16 : f32 to vector<4x512xf32>
    %39 = arith.subf %38, %17 : vector<4x512xf32>
    %40 = arith.mulf %39, %17 : vector<4x512xf32>
    %41 = math.exp %40 : vector<4x512xf32>
    %42 = arith.mulf %37, %41 : vector<4x512xf32>
    %cst_17 = arith.constant 1.000000e+00 : f32
    %43 = vector.broadcast %cst_17 : f32 to vector<4x512xf32>
    %44 = arith.subf %43, %42 : vector<4x512xf32>
    %cst_18 = arith.constant 0.000000e+00 : f32
    %45 = vector.broadcast %cst_18 : f32 to vector<4x512xf32>
    %46 = arith.cmpf olt, %16, %45 : vector<4x512xf32>
    %cst_19 = arith.constant 0.000000e+00 : f32
    %47 = vector.broadcast %cst_19 : f32 to vector<4x512xf32>
    %48 = arith.subf %47, %44 : vector<4x512xf32>
    %49 = arith.select %46, %48, %44 : vector<4x512xi1>, vector<4x512xf32>
    %cst_20 = arith.constant 1.000000e+00 : f32
    %50 = vector.broadcast %cst_20 : f32 to vector<4x512xf32>
    %51 = arith.addf %50, %49 : vector<4x512xf32>
    %cst_21 = arith.constant 5.000000e-01 : f32
    %52 = vector.broadcast %cst_21 : f32 to vector<4x512xf32>
    %53 = arith.mulf %52, %51 : vector<4x512xf32>
    %cst_22 = arith.constant -5.000000e-01 : f32
    %54 = vector.broadcast %cst_22 : f32 to vector<4x512xf32>
    %55 = arith.subf %54, %7 : vector<4x512xf32>
    %56 = arith.mulf %55, %11 : vector<4x512xf32>
    %cst_23 = arith.constant 0.707106769 : f32
    %57 = vector.broadcast %cst_23 : f32 to vector<4x512xf32>
    %58 = arith.mulf %57, %56 : vector<4x512xf32>
    %59 = math.absf %58 : vector<4x512xf32>
    %cst_24 = arith.constant 0.327591091 : f32
    %60 = vector.broadcast %cst_24 : f32 to vector<4x512xf32>
    %61 = arith.mulf %60, %59 : vector<4x512xf32>
    %cst_25 = arith.constant 1.000000e+00 : f32
    %62 = vector.broadcast %cst_25 : f32 to vector<4x512xf32>
    %63 = arith.addf %62, %61 : vector<4x512xf32>
    %cst_26 = arith.constant 1.000000e+00 : f32
    %64 = vector.broadcast %cst_26 : f32 to vector<4x512xf32>
    %65 = arith.divf %64, %63 : vector<4x512xf32>
    %cst_27 = arith.constant 1.06140542 : f32
    %66 = vector.broadcast %cst_27 : f32 to vector<4x512xf32>
    %67 = arith.mulf %65, %66 : vector<4x512xf32>
    %cst_28 = arith.constant -1.45315206 : f32
    %68 = vector.broadcast %cst_28 : f32 to vector<4x512xf32>
    %69 = arith.addf %68, %67 : vector<4x512xf32>
    %70 = arith.mulf %65, %69 : vector<4x512xf32>
    %cst_29 = arith.constant 1.42141378 : f32
    %71 = vector.broadcast %cst_29 : f32 to vector<4x512xf32>
    %72 = arith.addf %71, %70 : vector<4x512xf32>
    %73 = arith.mulf %65, %72 : vector<4x512xf32>
    %cst_30 = arith.constant -0.284496725 : f32
    %74 = vector.broadcast %cst_30 : f32 to vector<4x512xf32>
    %75 = arith.addf %74, %73 : vector<4x512xf32>
    %76 = arith.mulf %65, %75 : vector<4x512xf32>
    %cst_31 = arith.constant 0.254829586 : f32
    %77 = vector.broadcast %cst_31 : f32 to vector<4x512xf32>
    %78 = arith.addf %77, %76 : vector<4x512xf32>
    %79 = arith.mulf %65, %78 : vector<4x512xf32>
    %cst_32 = arith.constant 0.000000e+00 : f32
    %80 = vector.broadcast %cst_32 : f32 to vector<4x512xf32>
    %81 = arith.subf %80, %59 : vector<4x512xf32>
    %82 = arith.mulf %81, %59 : vector<4x512xf32>
    %83 = math.exp %82 : vector<4x512xf32>
    %84 = arith.mulf %79, %83 : vector<4x512xf32>
    %cst_33 = arith.constant 1.000000e+00 : f32
    %85 = vector.broadcast %cst_33 : f32 to vector<4x512xf32>
    %86 = arith.subf %85, %84 : vector<4x512xf32>
    %cst_34 = arith.constant 0.000000e+00 : f32
    %87 = vector.broadcast %cst_34 : f32 to vector<4x512xf32>
    %88 = arith.cmpf olt, %58, %87 : vector<4x512xf32>
    %cst_35 = arith.constant 0.000000e+00 : f32
    %89 = vector.broadcast %cst_35 : f32 to vector<4x512xf32>
    %90 = arith.subf %89, %86 : vector<4x512xf32>
    %91 = arith.select %88, %90, %86 : vector<4x512xi1>, vector<4x512xf32>
    %cst_36 = arith.constant 1.000000e+00 : f32
    %92 = vector.broadcast %cst_36 : f32 to vector<4x512xf32>
    %93 = arith.addf %92, %91 : vector<4x512xf32>
    %cst_37 = arith.constant 5.000000e-01 : f32
    %94 = vector.broadcast %cst_37 : f32 to vector<4x512xf32>
    %95 = arith.mulf %94, %93 : vector<4x512xf32>
    %96 = arith.subf %53, %95 : vector<4x512xf32>
    %cst_38 = arith.constant 9.99999971E-10 : f32
    %97 = vector.broadcast %cst_38 : f32 to vector<4x512xf32>
    %98 = arith.maximumf %96, %97 : vector<4x512xf32>
    %c0_39 = arith.constant 0 : index
    %c0_40 = arith.constant 0 : index
    %99 = vector.load %arg4[%c0_39, %c0_40] : memref<4x512xf32, #tpu.memory_space<vmem>>, vector<4x512xf32>
    tpu.vector_store %arg4[%c0_39, %c0_40], %5 {strides = array<i32>} : memref<4x512xf32, #tpu.memory_space<vmem>>, vector<4x512xf32>,
    %c0_41 = arith.constant 0 : index
    %c0_42 = arith.constant 0 : index
    %100 = vector.load %arg5[%c0_41, %c0_42] : memref<4x512xf32, #tpu.memory_space<vmem>>, vector<4x512xf32>
    tpu.vector_store %arg5[%c0_41, %c0_42], %98 {strides = array<i32>} : memref<4x512xf32, #tpu.memory_space<vmem>>, vector<4x512xf32>,
    return
  }
  func.func @transform_0(%arg0: i32) -> (i32, i32) {
    %c0_i32 = arith.constant 0 : i32
    %c0_i32_0 = arith.constant 0 : i32
    return %arg0, %c0_i32 : i32, i32
  }
  func.func @transform_1(%arg0: i32) -> (i32, i32) {
    %c0_i32 = arith.constant 0 : i32
    %c0_i32_0 = arith.constant 0 : i32
    return %arg0, %c0_i32 : i32, i32
  }
  func.func @transform_2(%arg0: i32) -> (i32, i32) {
    %c0_i32 = arith.constant 0 : i32
    %c0_i32_0 = arith.constant 0 : i32
    return %arg0, %c0_i32 : i32, i32
  }
  func.func @transform_3(%arg0: i32) -> (i32, i32) {
    %c0_i32 = arith.constant 0 : i32
    %c0_i32_0 = arith.constant 0 : i32
    return %arg0, %c0_i32 : i32, i32
  }
  func.func @transform_4(%arg0: i32) -> (i32, i32) {
    %c0_i32 = arith.constant 0 : i32
    %c0_i32_0 = arith.constant 0 : i32
    return %arg0, %c0_i32 : i32, i32
  }
}

</mosaic_0001>

<bundles_post_ra>
// kernel: gaussian_conditional_forward.1
= control target key start
LH: loop header
LB: loop body
LE: loop exit
PB: predicated region body
PF: predicated region fallthrough
CT: control target
= control target key end

     0   :  { %s259_s0 = inlined_call_operand.vmem [shape: f32[4,512], index: 0, kind: input, shape index: {}]   ;;  %s260_s1 = inlined_call_operand.vmem [shape: f32[4,512], index: 1, kind: input, shape index: {}]   ;;  %s261_s2 = inlined_call_operand.vmem [shape: f32[4,512], index: 2, kind: input, shape index: {}]   ;;  %s262_s3 = inlined_call_operand.vmem [shape: f32[4,512], index: 3, kind: output, shape index: {0}]   ;;  %s263_s4 = inlined_call_operand.vmem [shape: f32[4,512], index: 4, kind: output, shape index: {1}]  }
   0x1   :  { %v16_v0 = vld [vmem:[%s259_s0] sm:$0xff]  ;;  %v17_v5 = vld [vmem:[%s259_s0 + $0x8] sm:$0xff] }
   0x2   :  { %v18_v1 = vld [vmem:[%s260_s1] sm:$0xff]  ;;  %v19_v6 = vld [vmem:[%s260_s1 + $0x8] sm:$0xff] }
   0x3   :  { %v20_v2 = vld [vmem:[%s261_s2] sm:$0xff]  ;;  %v32_v4 = vmax.f32 %v18_v1, 0.11  ;;  %v21_v7 = vld [vmem:[%s261_s2 + $0x8] sm:$0xff]  ;;  %v33_v9 = vmax.f32 %v19_v6, 0.11 }
   0x4   :  { %v22_v3 = vsub.f32 %v16_v0, %v20_v2  ;;  %v23_v8 = vsub.f32 %v17_v5, %v21_v7 }
   0x5   :  { %168 = vrcp.f32 %v32_v4 }
   0x6   :  { %v166_v10 = vround.rtne.f32 %v22_v3  ;;  %v167_v11 = vround.rtne.f32 %v23_v8  ;;  %170 = vrcp.f32 %v33_v9 }
   0x8   :  { %v26_v12 = vadd.f32 %v166_v10, %v20_v2  ;;  %v27_v13 = vadd.f32 %v167_v11, %v21_v7 }
   0xa   :  { %v28_v14 = vsub.f32 %v26_v12, %v20_v2  ;;  %154 = vst [vmem:[%s262_s3] sm:$0xff] %v26_v12  ;;  %v29_v15 = vsub.f32 %v27_v13, %v21_v7  ;;  %155 = vst [vmem:[%s262_s3 + $0x8] sm:$0xff] %v27_v13 }
   0xc   :  { %v30_v16 = vand.u32 2147483647, %v28_v14  ;;  %v31_v17 = vand.u32 2147483647, %v29_v15 }
   0xe   :  { %v38_v18 = vsub.f32 0.5, %v30_v16  ;;  %v94_v19 = vsub.f32 -0.5, %v30_v16  ;;  %v39_v20 = vsub.f32 0.5, %v31_v17  ;;  %v95_v21 = vsub.f32 -0.5, %v31_v17 }
   0xf   :  { %v169_v22 = vpop.eup %168 }
  0x10   :  { %v171_v23 = vpop.eup %170  ;;  %v40_v24 = vmul.f32 %v169_v22, %v38_v18  ;;  %v96_v25 = vmul.f32 %v169_v22, %v94_v19 }
  0x11   :  { %v41_v26 = vmul.f32 %v171_v23, %v39_v20  ;;  %v97_v27 = vmul.f32 %v171_v23, %v95_v21 }
  0x12   :  { %v237_v28 = vmul.f32 0.70710677, %v40_v24  ;;  %v239_v29 = vmul.f32 0.70710677, %v96_v25 }
  0x13   :  { %v241_v30 = vmul.f32 0.70710677, %v41_v26  ;;  %v243_v31 = vmul.f32 0.70710677, %v97_v27 }
  0x14   :  { %v44_v32 = vand.u32 2147483647, %v237_v28  ;;  %v100_v33 = vand.u32 2147483647, %v239_v29  ;;  %vm84_vm0 = vcmp.lt.f32.partialorder %v237_v28, 0.0  ;;  %vm140_vm1 = vcmp.lt.f32.partialorder %v239_v29, 0.0 }
  0x15   :  { %v45_v34 = vand.u32 2147483647, %v241_v30  ;;  %v101_v35 = vand.u32 2147483647, %v243_v31  ;;  %vm85_vm2 = vcmp.lt.f32.partialorder %v241_v30, 0.0  ;;  %vm141_vm3 = vcmp.lt.f32.partialorder %v243_v31, 0.0 }
  0x16   :  { %v46_v36 = vmul.f32 0.3275911, %v44_v32  ;;  %v102_v37 = vmul.f32 0.3275911, %v100_v33  ;;  %v72_v44 = vsub.f32 0.0, %v44_v32  ;;  %v128_v45 = vsub.f32 0.0, %v100_v33 }
  0x17   :  { %v47_v38 = vmul.f32 0.3275911, %v45_v34  ;;  %v103_v41 = vmul.f32 0.3275911, %v101_v35  ;;  %v73_v47 = vsub.f32 0.0, %v45_v34  ;;  %v129_v50 = vsub.f32 0.0, %v101_v35 }
  0x18   :  { %v48_v39 = vadd.f32 1.0, %v46_v36  ;;  %v104_v40 = vadd.f32 1.0, %v102_v37  ;;  %v74_v46 = vmul.f32 %v72_v44, %v44_v32  ;;  %v130_v48 = vmul.f32 %v128_v45, %v100_v33 }
  0x19   :  { %v49_v42 = vadd.f32 1.0, %v47_v38  ;;  %v105_v43 = vadd.f32 1.0, %v103_v41  ;;  %v75_v54 = vmul.f32 %v73_v47, %v45_v34  ;;  %v131_v59 = vmul.f32 %v129_v50, %v101_v35 }
  0x1a   :  { %172 = vrcp.f32 %v48_v39  ;;  %v76_v53 = vmul.f32 1.442695, %v74_v46  ;;  %v132_v56 = vmul.f32 1.442695, %v130_v48 }
  0x1b   :  { %174 = vrcp.f32 %v104_v40  ;;  %v78_v0 = vmul.f32 1.442695, %v75_v54  ;;  %v134_v5 = vmul.f32 1.442695, %v131_v59 }
  0x1c   :  { %176 = vrcp.f32 %v49_v42 }
  0x1d   :  { %178 = vrcp.f32 %v105_v43 }
  0x1e   :  { %180 = vpow2.f32 %v76_v53 }
  0x1f   :  { %182 = vpow2.f32 %v132_v56 }
  0x20   :  { %184 = vpow2.f32 %v78_v0 }
  0x21   :  { %186 = vpow2.f32 %v134_v5 }
  0x24   :  { %v173_v49 = vpop.eup %172 }
  0x25   :  { %v175_v51 = vpop.eup %174  ;;  %v54_v52 = vmul.f32 1.0614054, %v173_v49 }
  0x26   :  { %v110_v55 = vmul.f32 1.0614054, %v175_v51  ;;  %v177_v58 = vpop.eup %176 }
  0x27   :  { %v56_v57 = vadd.f32 -1.4531521, %v54_v52  ;;  %v55_v62 = vmul.f32 1.0614054, %v177_v58  ;;  %v179_v63 = vpop.eup %178 }
  0x28   :  { %v112_v60 = vadd.f32 -1.4531521, %v110_v55  ;;  %v111_v4 = vmul.f32 1.0614054, %v179_v63  ;;  %v181_v22 = vpop.eup %180 }
  0x29   :  { %v58_v61 = vmul.f32 %v173_v49, %v56_v57  ;;  %v57_v3 = vadd.f32 -1.4531521, %v55_v62  ;;  %v183_v24 = vpop.eup %182 }
  0x2a   :  { %v114_v1 = vmul.f32 %v175_v51, %v112_v60  ;;  %v113_v9 = vadd.f32 -1.4531521, %v111_v4  ;;  %v185_v36 = vpop.eup %184 }
  0x2b   :  { %v60_v2 = vadd.f32 1.4214138, %v58_v61  ;;  %v59_v8 = vmul.f32 %v177_v58, %v57_v3  ;;  %v187_v41 = vpop.eup %186 }
  0x2c   :  { %v116_v6 = vadd.f32 1.4214138, %v114_v1  ;;  %v115_v13 = vmul.f32 %v179_v63, %v113_v9 }
  0x2d   :  { %v62_v7 = vmul.f32 %v173_v49, %v60_v2  ;;  %v61_v12 = vadd.f32 1.4214138, %v59_v8 }
  0x2e   :  { %v118_v10 = vmul.f32 %v175_v51, %v116_v6  ;;  %v117_v17 = vadd.f32 1.4214138, %v115_v13 }
  0x2f   :  { %v64_v11 = vadd.f32 -0.28449672, %v62_v7  ;;  %v63_v16 = vmul.f32 %v177_v58, %v61_v12 }
  0x30   :  { %v120_v14 = vadd.f32 -0.28449672, %v118_v10  ;;  %v119_v21 = vmul.f32 %v179_v63, %v117_v17 }
  0x31   :  { %v66_v15 = vmul.f32 %v173_v49, %v64_v11  ;;  %v65_v20 = vadd.f32 -0.28449672, %v63_v16 }
  0x32   :  { %v122_v18 = vmul.f32 %v175_v51, %v120_v14  ;;  %v121_v27 = vadd.f32 -0.28449672, %v119_v21 }
  0x33   :  { %v68_v19 = vadd.f32 0.2548296, %v66_v15  ;;  %v67_v26 = vmul.f32 %v177_v58, %v65_v20 }
  0x34   :  { %v124_v23 = vadd.f32 0.2548296, %v122_v18  ;;  %v123_v35 = vmul.f32 %v179_v63, %v121_v27 }
  0x35   :  { %v70_v25 = vmul.f32 %v173_v49, %v68_v19  ;;  %v69_v34 = vadd.f32 0.2548296, %v67_v26 }
  0x36   :  { %v126_v32 = vmul.f32 %v175_v51, %v124_v23  ;;  %v125_v40 = vadd.f32 0.2548296, %v123_v35 }
  0x37   :  { %v80_v33 = vmul.f32 %v181_v22, %v70_v25  ;;  %v71_v39 = vmul.f32 %v177_v58, %v69_v34 }
  0x38   :  { %v136_v37 = vmul.f32 %v183_v24, %v126_v32  ;;  %v127_v45 = vmul.f32 %v179_v63, %v125_v40 }
  0x39   :  { %v82_v38 = vsub.f32 1.0, %v80_v33  ;;  %v81_v44 = vmul.f32 %v185_v36, %v71_v39 }
  0x3a   :  { %v138_v42 = vsub.f32 1.0, %v136_v37  ;;  %v137_v49 = vmul.f32 %v187_v41, %v127_v45 }
  0x3b   :  { %v86_v43 = vsub.f32 0.0, %v82_v38  ;;  %v83_v48 = vsub.f32 1.0, %v81_v44 }
  0x3c   :  { %v142_v46 = vsub.f32 0.0, %v138_v42  ;;  %v139_v54 = vsub.f32 1.0, %v137_v49 }
  0x3d   :  { %v88_v47 = vsel %vm84_vm0, %v86_v43, %v82_v38  ;;  %v87_v53 = vsub.f32 0.0, %v83_v48 }
  0x3e   :  { %v90_v50 = vadd.f32 1.0, %v88_v47  ;;  %v144_v51 = vsel %vm140_vm1, %v142_v46, %v138_v42  ;;  %v143_v57 = vsub.f32 0.0, %v139_v54 }
  0x3f   :  { %v146_v52 = vadd.f32 1.0, %v144_v51  ;;  %v89_v56 = vsel %vm85_vm2, %v87_v53, %v83_v48 }
  0x40   :  { %v92_v55 = vmul.f32 0.5, %v90_v50  ;;  %v91_v29 = vadd.f32 1.0, %v89_v56  ;;  %v145_v59 = vsel %vm141_vm3, %v143_v57, %v139_v54 }
  0x41   :  { %v148_v28 = vmul.f32 0.5, %v146_v52  ;;  %v147_v61 = vadd.f32 1.0, %v145_v59 }
  0x42   :  { %v93_v60 = vmul.f32 0.5, %v91_v29 }
  0x43   :  { %v150_v58 = vsub.f32 %v92_v55, %v148_v28  ;;  %v149_v63 = vmul.f32 0.5, %v147_v61 }
  0x45   :  { %v152_v62 = vmax.f32 %v150_v58, 1e-09  ;;  %v151_v30 = vsub.f32 %v93_v60, %v149_v63 }
  0x47   :  { %156 = vst [vmem:[%s263_s4] sm:$0xff] %v152_v62  ;;  %v153_v0 = vmax.f32 %v151_v30, 1e-09 }
  0x49   :  { %157 = vst [vmem:[%s263_s4 + $0x8] sm:$0xff] %v153_v0 }

</bundles_post_ra>
